<compile_context>
chip_gen: v7x
topology: tpu7x:2x2x1
jax: 0.10.0
libtpu: 0.0.40
codegen_flags: <defaults>
</compile_context>

<pallas_src>
import jax
import jax.numpy as jnp
from jax.experimental import pallas as pl
from jax.experimental.pallas import tpu as pltpu


def _head_kernel(f1_ref, f2_ref, w1a_ref, w1b_ref, b1_ref, alpha_ref,
                 w2d_ref, b2d_ref, out_ref, acc_ref):
    k = pl.program_id(1)

    @pl.when(k == 0)
    def _():
        acc_ref[...] = jnp.zeros_like(acc_ref)

    # Linear 1 on the MXU, split over the two feature halves and K-tiled.
    # x tiles are cast to bf16 here (not in the wrapper) -> no extra HBM pass.
    f1 = f1_ref[...].astype(jnp.bfloat16)
    f2 = f2_ref[...].astype(jnp.bfloat16)
    acc_ref[...] += (
        jnp.dot(f1, w1a_ref[...], preferred_element_type=jnp.float32)
        + jnp.dot(f2, w1b_ref[...], preferred_element_type=jnp.float32)
    )

    @pl.when(k == pl.num_programs(1) - 1)
    def _():
        h = acc_ref[...] + b1_ref[...]
        # PReLU with per-channel alpha (f32 VPU math; v5e has no bf16 VPU path).
        h = jnp.where(h > 0, h, alpha_ref[...] * h)
        # Linear 2 + 2-class softmax collapsed into a sigmoid of the logit diff:
        #   pred[:, 1] = sigmoid(h @ (w2[:,1]-w2[:,0]) + (b2[1]-b2[0]))
        logit = jnp.sum(h * w2d_ref[...], axis=-1, keepdims=True) + b2d_ref[...]
        # Exact sigmoid (exp on the EUP, exact divide): keeps probs in [0, 1].
        out_ref[...] = (1.0 / (1.0 + jnp.exp(-logit))).astype(out_ref.dtype)


def _scores_xla(f1, f2, params):
    """Pure-JAX fallback for tiny shapes (pallas_call overhead dominates)."""
    w1_t, b1, alpha, w2_t, b2 = params
    H = w1_t.shape[1]
    h = f1 @ w1_t[:H] + f2 @ w1_t[H:] + b1
    h = jnp.where(h > 0, h, alpha * h)
    logit = h @ (w2_t[:, 1:2] - w2_t[:, 0:1]) + (b2[0, 1] - b2[0, 0])
    return jax.nn.sigmoid(logit)[:, 0]


def _choose_k_tile(H, block_k):
    if block_k is not None:
        if H % block_k != 0:
            raise ValueError(f"block_k={block_k} must divide nhid={H}")
        return block_k
    # K-tile only when the double-buffered bf16 w1 halves would eat too much
    # VMEM (relevant for large nhid, esp. on v7x's 64 MiB VMEM).
    if 2 * 2 * H * H * 2 <= 24 * 1024 * 1024:
        return H
    for tk in (2048, 1024, 512, 256, 128):
        if H % tk == 0:
            return tk
    return H  # awkward nhid: keep resident and rely on vmem_limit_bytes


def head_test_scores(feature1, feature2, params, *, block_b=1024, block_k=None,
                     use_pallas=None, core_parallel=False):
    """pred[:, 1] (softmax prob of class 1) for rows of cat(feature1, feature2).

    feature1/feature2: (B, nhid).  block_b: batch tile (1024 good for v5e/v6e,
    512/256 on v7x).  core_parallel=True -> pltpu.CORE_PARALLEL on the batch
    axis (use both TensorCores on v7x; leave False on single-TC chips).
    """
    w1_t, b1, alpha, w2_t, b2 = params
    B, H = feature1.shape

    if use_pallas is None:
        use_pallas = (B * H) >= 4096  # tiny shapes: plain XLA is faster
    if not use_pallas:
        return _scores_xla(feature1, feature2, params)

    # ---- weight-side prep (param-sized; pre-cast once for repeated calls) ----
    # Pad the N dim (nhid) of the first GEMM to a multiple of 128 on the weight
    # side only; padded columns produce h==0 and w2_diff==0 there, so results
    # are unchanged and x is never touched.
    Hp = ((H + 127) // 128) * 128
    w1a = w1_t[:H].astype(jnp.bfloat16)           # (H, H)  top half  (feature1)
    w1b = w1_t[H:].astype(jnp.bfloat16)           # (H, H)  bottom half (feature2)
    w2d = (w2_t[:, 1] - w2_t[:, 0]).reshape(1, H).astype(jnp.float32)
    b2d = (b2[0, 1] - b2[0, 0]).reshape(1, 1).astype(jnp.float32)
    b1p, alphap = b1, alpha
    if Hp != H:
        pad = ((0, 0), (0, Hp - H))
        w1a, w1b = jnp.pad(w1a, pad), jnp.pad(w1b, pad)
        b1p, alphap, w2d = jnp.pad(b1, pad), jnp.pad(alpha, pad), jnp.pad(w2d, pad)
    # TODO(synk): for best MXU utilization the K dim (nhid per half) should also
    # be a multiple of 128; padding it would require padding x, so leave to caller.

    # ---- tiling ----
    tb = B if B <= block_b else block_b
    tk = _choose_k_tile(H, block_k)
    nb, nk = pl.cdiv(B, tb), H // tk
    grid = (nb, nk)

    # ---- VMEM budget (double-buffered tiles + accumulator) ----
    tile_bytes = (
        2 * (2 * tb * tk * 4)        # f1, f2: double-buffered f32 x tiles
        + 2 * (2 * tk * Hp * 2)      # w1a, w1b: double-buffered bf16 tiles
        + 2 * (tb * 4)               # out column, double-buffered
        + tb * Hp * 4                # f32 accumulator scratch
        + 3 * (2 * Hp * 4) + 256     # b1 / alpha / w2d / b2d
    )
    vmem_limit = min(max(int(tile_bytes * 1.5) + (4 << 20), 32 << 20), 100 << 20)

    batch_sem = pltpu.CORE_PARALLEL if core_parallel else pltpu.PARALLEL
    compiler_params = pltpu.CompilerParams(
        dimension_semantics=(batch_sem, pltpu.ARBITRARY),  # K last, reduction
        vmem_limit_bytes=vmem_limit,
    )
    cost = pl.CostEstimate(
        flops=2 * B * (2 * H) * Hp + 4 * B * Hp,
        transcendentals=B,
        bytes_accessed=2 * B * H * 4 + nb * (2 * H * Hp * 2) + B * 4,
    )

    # NOTE: constant-index operands (w1a/w1b when nk==1, b1, alpha, w2d, b2d)
    # could use pipeline_mode=pl.Buffered(1) to drop their second VMEM buffer.
    scores = pl.pallas_call(
        _head_kernel,
        out_shape=jax.ShapeDtypeStruct((B, 1), jnp.float32),
        grid=grid,
        in_specs=[
            pl.BlockSpec((tb, tk), lambda i, k: (i, k)),   # feature1 tile
            pl.BlockSpec((tb, tk), lambda i, k: (i, k)),   # feature2 tile
            pl.BlockSpec((tk, Hp), lambda i, k: (k, 0)),   # w1 top half
            pl.BlockSpec((tk, Hp), lambda i, k: (k, 0)),   # w1 bottom half
            pl.BlockSpec((1, Hp), lambda i, k: (0, 0)),    # b1
            pl.BlockSpec((1, Hp), lambda i, k: (0, 0)),    # PReLU alpha
            pl.BlockSpec((1, Hp), lambda i, k: (0, 0)),    # w2[:,1]-w2[:,0]
            pl.BlockSpec((1, 1), lambda i, k: (0, 0)),     # b2[1]-b2[0]
        ],
        out_specs=pl.BlockSpec((tb, 1), lambda i, k: (i, 0)),
        scratch_shapes=[pltpu.VMEM((tb, Hp), jnp.float32)],
        compiler_params=compiler_params,
        cost_estimate=cost,
    )(feature1, feature2, w1a, w1b, b1p, alphap, w2d, b2d)
    return scores[:, 0]


def head_test_forward(feature1, feature2, params, no_list=False, **kwargs):
    """Mirrors HEAD_test.forward semantics.

    2-D features: returns pred[:, 1] (array if no_list=True, else python list).
    1-D features: returns python bool is_same == (pred[0,0] <= pred[0,1]).
    """
    if feature1.ndim == 1:
        score = head_test_scores(feature1[None, :], feature2[None, :], params,
                                 **kwargs)
        # pred[0,0] <= pred[0,1]  <=>  sigmoid(logit_diff) >= 0.5
        return bool(score[0] >= 0.5)
    scores = head_test_scores(feature1, feature2, params, **kwargs)
    if no_list:
        return scores
    return list(jax.device_get(scores))  # host-side glue, like the torch branch


def init_params(key, nhid):
    """Deterministic parameter init matching the shapes of HEAD_test.__init__."""
    k1, k2, k3, k4 = jax.random.split(key, 4)
    lim1 = 1.0 / jnp.sqrt(2.0 * nhid)
    lim2 = 1.0 / jnp.sqrt(1.0 * nhid)
    # Linear weights stored already transposed (in, out): y = x @ W.T + b.
    w1_t = jax.random.uniform(k1, (2 * nhid, nhid), jnp.float32, -lim1, lim1)
    b1 = jax.random.uniform(k2, (1, nhid), jnp.float32, -lim1, lim1)
    alpha = jnp.full((1, nhid), 0.25, jnp.float32)  # nn.PReLU(nhid) default
    w2_t = jax.random.uniform(k3, (nhid, 2), jnp.float32, -lim2, lim2)
    b2 = jax.random.uniform(k4, (1, 2), jnp.float32, -lim2, lim2)
    return w1_t, b1, alpha, w2_t, b2


def _reference(x, params):
    """Pure-JAX f32 reference of the full softmax head."""
    w1_t, b1, alpha, w2_t, b2 = params
    h = x @ w1_t + b1
    h = jnp.where(h > 0, h, alpha * h)
    logits = h @ w2_t + b2
    return jax.nn.softmax(logits, axis=1)


if __name__ == "__main__":
    key = jax.random.PRNGKey(0)
    kf1, kf2, kp, kg1, kg2, kq = jax.random.split(key, 6)

    # ---- small shape (single block per operand), force the Pallas path ----
    nhid, batch = 32, 8
    f1 = jax.random.normal(kf1, (batch, nhid), jnp.float32)
    f2 = jax.random.normal(kf2, (batch, nhid), jnp.float32)
    params = init_params(kp, nhid)

    scores = head_test_forward(f1, f2, params, no_list=True, use_pallas=True)
    scores = jax.block_until_ready(scores)
    ref = _reference(jnp.concatenate([f1, f2], axis=1), params)[:, 1]
    assert jnp.allclose(scores, ref, atol=2e-2, rtol=0.0), (scores, ref)

    # 1-D path (python bool), still through the kernel (tb = 1).
    is_same = head_test_forward(f1[0], f2[0], params, use_pallas=True)
    assert isinstance(is_same, bool)

    # list-returning branch via the tiny-shape XLA fallback (auto-selected).
    score_list = head_test_forward(f1, f2, params)
    assert isinstance(score_list, list) and len(score_list) == batch

    # ---- larger shape exercising batch tiling + K-tiled accumulation ----
    nhid2, batch2 = 256, 64
    g1 = jax.random.normal(kg1, (batch2, nhid2), jnp.float32)
    g2 = jax.random.normal(kg2, (batch2, nhid2), jnp.float32)
    params2 = init_params(kq, nhid2)
    scores2 = head_test_scores(g1, g2, params2, block_b=32, block_k=128,
                               use_pallas=True)
    scores2 = jax.block_until_ready(scores2)
    ref2 = _reference(jnp.concatenate([g1, g2], axis=1), params2)[:, 1]
    assert jnp.allclose(scores2, ref2, atol=2e-2, rtol=0.0), (scores2, ref2)

    print("KERNEL_OK")
</pallas_src>

<mosaic_0001>
module attributes {stable_mosaic.version = 11 : i64} {
  func.func @_head_kernel(%arg0: i32, %arg1: i32, %arg2: memref<8x32xf32, #tpu.memory_space<vmem>>, %arg3: memref<8x32xf32, #tpu.memory_space<vmem>>, %arg4: memref<32x128xbf16, #tpu.memory_space<vmem>>, %arg5: memref<32x128xbf16, #tpu.memory_space<vmem>>, %arg6: memref<1x128xf32, #tpu.memory_space<vmem>>, %arg7: memref<1x128xf32, #tpu.memory_space<vmem>>, %arg8: memref<1x128xf32, #tpu.memory_space<vmem>>, %arg9: memref<1x1xf32, #tpu.memory_space<vmem>>, %arg10: memref<8x1xf32, #tpu.memory_space<vmem>>, %arg11: memref<8x128xf32, #tpu.memory_space<vmem>>) attributes {dimension_semantics = [#tpu.dimension_semantics<parallel>, #tpu.dimension_semantics<arbitrary>], iteration_bounds = array<i64: 1, 1>, scalar_prefetch = 0 : i64, scratch_operands = 1 : i64, tpu.core_type = #tpu.core_type<tc>, window_params = [{transform_indices = @transform_0, window_bounds = array<i64: 8, 32>}, {transform_indices = @transform_1, window_bounds = array<i64: 8, 32>}, {transform_indices = @transform_2, window_bounds = array<i64: 32, 128>}, {transform_indices = @transform_3, window_bounds = array<i64: 32, 128>}, {pipeline_mode = #tpu.pipeline_mode<synchronous>, transform_indices = @transform_4, window_bounds = array<i64: 1, 128>}, {pipeline_mode = #tpu.pipeline_mode<synchronous>, transform_indices = @transform_5, window_bounds = array<i64: 1, 128>}, {pipeline_mode = #tpu.pipeline_mode<synchronous>, transform_indices = @transform_6, window_bounds = array<i64: 1, 128>}, {pipeline_mode = #tpu.pipeline_mode<synchronous>, transform_indices = @transform_7, window_bounds = array<i64: 1, 1>}, {transform_indices = @transform_8, window_bounds = array<i64: 8, 1>}]} {
    %c0_i32 = arith.constant 0 : i32
    %0 = arith.cmpi eq, %arg1, %c0_i32 : i32
    %1 = arith.extui %0 : i1 to i32
    %c0_i32_0 = arith.constant 0 : i32
    %2 = arith.cmpi ne, %1, %c0_i32_0 : i32
    scf.if %2 {
      %cst_15 = arith.constant 0.000000e+00 : f32
      %18 = vector.broadcast %cst_15 : f32 to vector<8x128xf32>
      %c0_16 = arith.constant 0 : index
      %c0_17 = arith.constant 0 : index
      %19 = vector.load %arg11[%c0_16, %c0_17] : memref<8x128xf32, #tpu.memory_space<vmem>>, vector<8x128xf32>
      tpu.vector_store %arg11[%c0_16, %c0_17], %18 {strides = array<i32>} : memref<8x128xf32, #tpu.memory_space<vmem>>, vector<8x128xf32>,
    } else {
    }
    %c0 = arith.constant 0 : index
    %c0_1 = arith.constant 0 : index
    %3 = vector.load %arg2[%c0, %c0_1] : memref<8x32xf32, #tpu.memory_space<vmem>>, vector<8x32xf32>
    %4 = arith.truncf %3 : vector<8x32xf32> to vector<8x32xbf16>
    %c0_2 = arith.constant 0 : index
    %c0_3 = arith.constant 0 : index
    %5 = vector.load %arg3[%c0_2, %c0_3] : memref<8x32xf32, #tpu.memory_space<vmem>>, vector<8x32xf32>
    %6 = arith.truncf %5 : vector<8x32xf32> to vector<8x32xbf16>
    %c0_4 = arith.constant 0 : index
    %c0_5 = arith.constant 0 : index
    %7 = vector.load %arg11[%c0_4, %c0_5] : memref<8x128xf32, #tpu.memory_space<vmem>>, vector<8x128xf32>
    %c0_6 = arith.constant 0 : index
    %c0_7 = arith.constant 0 : index
    %8 = vector.load %arg4[%c0_6, %c0_7] : memref<32x128xbf16, #tpu.memory_space<vmem>>, vector<32x128xbf16>
    %cst = arith.constant dense<0.000000e+00> : vector<8x128xf32>
    %9 = tpu.matmul %4, %8, %cst {dimension_numbers = #tpu.dot_dimension_numbers<[1], [0], [0], [1], [0, 0, 1, 1], [], []>} : vector<8x32xbf16>, vector<32x128xbf16>, vector<8x128xf32> -> vector<8x128xf32>
    %c0_8 = arith.constant 0 : index
    %c0_9 = arith.constant 0 : index
    %10 = vector.load %arg5[%c0_8, %c0_9] : memref<32x128xbf16, #tpu.memory_space<vmem>>, vector<32x128xbf16>
    %cst_10 = arith.constant dense<0.000000e+00> : vector<8x128xf32>
    %11 = tpu.matmul %6, %10, %cst_10 {dimension_numbers = #tpu.dot_dimension_numbers<[1], [0], [0], [1], [0, 0, 1, 1], [], []>} : vector<8x32xbf16>, vector<32x128xbf16>, vector<8x128xf32> -> vector<8x128xf32>
    %12 = arith.addf %9, %11 : vector<8x128xf32>
    %13 = arith.addf %7, %12 : vector<8x128xf32>
    %c0_11 = arith.constant 0 : index
    %c0_12 = arith.constant 0 : index
    %14 = vector.load %arg11[%c0_11, %c0_12] : memref<8x128xf32, #tpu.memory_space<vmem>>, vector<8x128xf32>
    tpu.vector_store %arg11[%c0_11, %c0_12], %13 {strides = array<i32>} : memref<8x128xf32, #tpu.memory_space<vmem>>, vector<8x128xf32>,
    %c0_i32_13 = arith.constant 0 : i32
    %15 = arith.cmpi eq, %arg1, %c0_i32_13 : i32
    %16 = arith.extui %15 : i1 to i32
    %c0_i32_14 = arith.constant 0 : i32
    %17 = arith.cmpi ne, %16, %c0_i32_14 : i32
    scf.if %17 {
      %c0_15 = arith.constant 0 : index
      %c0_16 = arith.constant 0 : index
      %18 = vector.load %arg11[%c0_15, %c0_16] : memref<8x128xf32, #tpu.memory_space<vmem>>, vector<8x128xf32>
      %c0_17 = arith.constant 0 : index
      %c0_18 = arith.constant 0 : index
      %19 = vector.load %arg6[%c0_17, %c0_18] : memref<1x128xf32, #tpu.memory_space<vmem>>, vector<1x128xf32>
      %20 = vector.broadcast %19 : vector<1x128xf32> to vector<8x128xf32>
      %21 = arith.addf %18, %20 : vector<8x128xf32>
      %cst_19 = arith.constant 0.000000e+00 : f32
      %22 = vector.broadcast %cst_19 : f32 to vector<8x128xf32>
      %23 = arith.cmpf ogt, %21, %22 : vector<8x128xf32>
      %c0_20 = arith.constant 0 : index
      %c0_21 = arith.constant 0 : index
      %24 = vector.load %arg7[%c0_20, %c0_21] : memref<1x128xf32, #tpu.memory_space<vmem>>, vector<1x128xf32>
      %25 = vector.broadcast %24 : vector<1x128xf32> to vector<8x128xf32>
      %26 = arith.mulf %25, %21 : vector<8x128xf32>
      %27 = arith.select %23, %21, %26 : vector<8x128xi1>, vector<8x128xf32>
      %c0_22 = arith.constant 0 : index
      %c0_23 = arith.constant 0 : index
      %28 = vector.load %arg8[%c0_22, %c0_23] : memref<1x128xf32, #tpu.memory_space<vmem>>, vector<1x128xf32>
      %29 = vector.broadcast %28 : vector<1x128xf32> to vector<8x128xf32>
      %30 = arith.mulf %27, %29 : vector<8x128xf32>
      %cst_24 = arith.constant dense<0.000000e+00> : vector<8xf32>
      %31 = vector.multi_reduction <add>, %30, %cst_24 [1] : vector<8x128xf32> to vector<8xf32>
      %32 = vector.shape_cast %31 : vector<8xf32> to vector<8x1xf32>
      %c0_25 = arith.constant 0 : index
      %c0_26 = arith.constant 0 : index
      %33 = vector.load %arg9[%c0_25, %c0_26] : memref<1x1xf32, #tpu.memory_space<vmem>>, vector<1x1xf32>
      %34 = vector.broadcast %33 : vector<1x1xf32> to vector<8x1xf32>
      %35 = arith.addf %32, %34 : vector<8x1xf32>
      %cst_27 = arith.constant 0.000000e+00 : f32
      %36 = vector.broadcast %cst_27 : f32 to vector<8x1xf32>
      %37 = arith.subf %36, %35 : vector<8x1xf32>
      %38 = math.exp %37 : vector<8x1xf32>
      %cst_28 = arith.constant 1.000000e+00 : f32
      %39 = vector.broadcast %cst_28 : f32 to vector<8x1xf32>
      %40 = arith.addf %39, %38 : vector<8x1xf32>
      %cst_29 = arith.constant 1.000000e+00 : f32
      %41 = vector.broadcast %cst_29 : f32 to vector<8x1xf32>
      %42 = arith.divf %41, %40 : vector<8x1xf32>
      %c0_30 = arith.constant 0 : index
      %c0_31 = arith.constant 0 : index
      %43 = vector.load %arg10[%c0_30, %c0_31] : memref<8x1xf32, #tpu.memory_space<vmem>>, vector<8x1xf32>
      tpu.vector_store %arg10[%c0_30, %c0_31], %42 {strides = array<i32>} : memref<8x1xf32, #tpu.memory_space<vmem>>, vector<8x1xf32>,
    } else {
    }
    return
  }
  func.func @transform_0(%arg0: i32, %arg1: i32) -> (i32, i32) {
    %c0_i32 = arith.constant 0 : i32
    return %arg0, %arg1 : i32, i32
  }
  func.func @transform_1(%arg0: i32, %arg1: i32) -> (i32, i32) {
    %c0_i32 = arith.constant 0 : i32
    return %arg0, %arg1 : i32, i32
  }
  func.func @transform_2(%arg0: i32, %arg1: i32) -> (i32, i32) {
    %c0_i32 = arith.constant 0 : i32
    %c0_i32_0 = arith.constant 0 : i32
    return %arg1, %c0_i32 : i32, i32
  }
  func.func @transform_3(%arg0: i32, %arg1: i32) -> (i32, i32) {
    %c0_i32 = arith.constant 0 : i32
    %c0_i32_0 = arith.constant 0 : i32
    return %arg1, %c0_i32 : i32, i32
  }
  func.func @transform_4(%arg0: i32, %arg1: i32) -> (i32, i32) {
    %c0_i32 = arith.constant 0 : i32
    %c0_i32_0 = arith.constant 0 : i32
    %c0_i32_1 = arith.constant 0 : i32
    return %c0_i32, %c0_i32_0 : i32, i32
  }
  func.func @transform_5(%arg0: i32, %arg1: i32) -> (i32, i32) {
    %c0_i32 = arith.constant 0 : i32
    %c0_i32_0 = arith.constant 0 : i32
    %c0_i32_1 = arith.constant 0 : i32
    return %c0_i32, %c0_i32_0 : i32, i32
  }
  func.func @transform_6(%arg0: i32, %arg1: i32) -> (i32, i32) {
    %c0_i32 = arith.constant 0 : i32
    %c0_i32_0 = arith.constant 0 : i32
    %c0_i32_1 = arith.constant 0 : i32
    return %c0_i32, %c0_i32_0 : i32, i32
  }
  func.func @transform_7(%arg0: i32, %arg1: i32) -> (i32, i32) {
    %c0_i32 = arith.constant 0 : i32
    %c0_i32_0 = arith.constant 0 : i32
    %c0_i32_1 = arith.constant 0 : i32
    return %c0_i32, %c0_i32_0 : i32, i32
  }
  func.func @transform_8(%arg0: i32, %arg1: i32) -> (i32, i32) {
    %c0_i32 = arith.constant 0 : i32
    %c0_i32_0 = arith.constant 0 : i32
    return %arg0, %c0_i32 : i32, i32
  }
}

</mosaic_0001>

<bundles_post_ra>
// kernel: tpu_custom_call.1
= control target key start
LH: loop header
LB: loop body
LE: loop exit
PB: predicated region body
PF: predicated region fallthrough
CT: control target
= control target key end

     0   :  { %s527_s0 = inlined_call_operand.hbm [shape: f32[8,32], index: 0, kind: input, shape index: {}]   ;;  %s528_s1 = inlined_call_operand.hbm [shape: f32[8,32], index: 1, kind: input, shape index: {}]   ;;  %s529_s2 = inlined_call_operand.hbm [shape: bf16[32,128], index: 2, kind: input, shape index: {}]   ;;  %s530_s3 = inlined_call_operand.hbm [shape: bf16[32,128], index: 3, kind: input, shape index: {}]   ;;  %s531_s4 = inlined_call_operand.vmem [shape: f32[1,128], index: 4, kind: input, shape index: {}]   ;;  %s532_s5 = inlined_call_operand.vmem [shape: f32[1,128], index: 5, kind: input, shape index: {}]   ;;  %s533_s6 = inlined_call_operand.vmem [shape: f32[1,128], index: 6, kind: input, shape index: {}]   ;;  %s534_s7 = inlined_call_operand.<no memory space> [shape: f32[1,1], index: 7, kind: input, shape index: {}]   ;;  %s535_s8 = inlined_call_operand.vmem [shape: f32[8,1], index: 8, kind: output, shape index: {}]  }
   0x1   :  { %v13_v0 = vstv %s534_s7 }
   0x2   :  { %14 = vst [vmem:[#allocation3] sm:$0x1] %v13_v0 }
   0x3   :  { %15 = vsyncpa [#allocation5], 0 }
   0x4   :  { %16 = vsyncpa [#allocation7], 0 }
   0x5   :  { %17 = vsyncpa [#allocation10], 0  ;;  %s411_s29 = smov [#allocation6]   ;;  %s412_s9 = smov [#allocation4]  }
   0x6   :  { %s34_s30 = sshll.u32 %s411_s29, 4  ;;  %s24_s10 = sshll.u32 %s412_s9, 4  ;;  %s35_s30 = int_to_ptr.vmem [resolvable:$true] %s34_s30  ;;  %s25_s10 = int_to_ptr.vmem [resolvable:$true] %s24_s10 }
   0x7   :  { %s317_s13 = scalar_lea.hbm %s528_s1, 128 }
   0x8   :  { %p318_p0 = scmp.ne.s32.totalorder %s528_s1, %s317_s13  ;;  %p321_p1 = scmp.lt.u32.totalorder %s317_s13, %s528_s1 }
   0xa   :  { %p323_p2 = pnand %p321_p1, %p318_p0 }
   0xc   :  { %326 = shalt.err (!%p323_p2)
}
   0xd   :  { %s327_s17 = scalar_lea.vmem %s35_s30, 128  ;;  %p332_p4 = scmp.lt.s32.totalorder %s35_s30, %s35_s30 }
   0xe   :  { %p328_p3 = scmp.ne.s32.totalorder %s35_s30, %s327_s17  ;;  %p333_p5 = scmp.lt.s32.totalorder %s327_s17, %s327_s17 }
  0x10   :  { %p334_p6 = por %p333_p5, %p332_p4 }
  0x12   :  { %p335_p7 = pnand %p334_p6, %p328_p3 }
  0x14   :  { %338 = shalt.err (!%p335_p7)
}
  0x15   :  { %37 = dma.hbm_to_vmem [thread:$0]  %s528_s1, 128, %s35_s30, [#allocation7]  }
  0x16   :  { %s339_s22 = scalar_lea.hbm %s527_s0, 128 }
  0x17   :  { %p340_p8 = scmp.ne.s32.totalorder %s527_s0, %s339_s22  ;;  %p343_p9 = scmp.lt.u32.totalorder %s339_s22, %s527_s0 }
  0x19   :  { %p345_p10 = pnand %p343_p9, %p340_p8 }
  0x1b   :  { %348 = shalt.err (!%p345_p10)
}
  0x1c   :  { %s349_s27 = scalar_lea.vmem %s25_s10, 128  ;;  %p354_p12 = scmp.lt.s32.totalorder %s25_s10, %s25_s10 }
  0x1d   :  { %p350_p11 = scmp.ne.s32.totalorder %s25_s10, %s349_s27  ;;  %p355_p13 = scmp.lt.s32.totalorder %s349_s27, %s349_s27 }
  0x1f   :  { %p356_p0 = por %p355_p13, %p354_p12 }
  0x21   :  { %p357_p1 = pnand %p356_p0, %p350_p11 }
  0x23   :  { %360 = shalt.err (!%p357_p1)
}
  0x24   :  { %27 = dma.hbm_to_vmem [thread:$0]  %s527_s0, 128, %s25_s10, [#allocation5]  }
  0x25   :  { %s413_s29 = smov [#allocation8]   ;;  %s361_s12 = scalar_lea.hbm %s529_s2, 256 }
  0x26   :  { %s43_s30 = sshll.u32 %s413_s29, 4  ;;  %p362_p2 = scmp.ne.s32.totalorder %s529_s2, %s361_s12  ;;  %s44_s30 = int_to_ptr.vmem [resolvable:$true] %s43_s30 }
  0x27   :  { %p365_p3 = scmp.lt.u32.totalorder %s361_s12, %s529_s2 }
  0x29   :  { %p367_p4 = pnand %p365_p3, %p362_p2 }
  0x2b   :  { %370 = shalt.err (!%p367_p4)
}
  0x2c   :  { %s371_s7 = scalar_lea.vmem %s44_s30, 256  ;;  %p376_p6 = scmp.lt.s32.totalorder %s44_s30, %s44_s30 }
  0x2d   :  { %p372_p5 = scmp.ne.s32.totalorder %s44_s30, %s371_s7  ;;  %p377_p7 = scmp.lt.s32.totalorder %s371_s7, %s371_s7 }
  0x2f   :  { %p378_p8 = por %p377_p7, %p376_p6 }
  0x31   :  { %p379_p9 = pnand %p378_p8, %p372_p5 }
  0x33   :  { %382 = shalt.err (!%p379_p9)
}
  0x34   :  { %s414_s0 = smov 64   ;;  %s415_s10 = smov 4  }
  0x35   :  { %49 = dma.hbm_to_vmem [thread:$0]  %s529_s2, 256, %s44_s30, [#allocation7], %s414_s0, %s414_s0, %s415_s10  }
  0x36   :  { %s416_s19 = smov [#allocation9]   ;;  %s383_s23 = scalar_lea.hbm %s530_s3, 256 }
  0x37   :  { %s55_s20 = sshll.u32 %s416_s19, 4  ;;  %p384_p10 = scmp.ne.s32.totalorder %s530_s3, %s383_s23  ;;  %s56_s20 = int_to_ptr.vmem [resolvable:$true] %s55_s20 }
  0x38   :  { %p387_p11 = scmp.lt.u32.totalorder %s383_s23, %s530_s3 }
  0x3a   :  { %p389_p12 = pnand %p387_p11, %p384_p10 }
  0x3c   :  { %392 = shalt.err (!%p389_p12)
}
  0x3d   :  { %s393_s1 = scalar_lea.vmem %s56_s20, 256  ;;  %p398_p0 = scmp.lt.s32.totalorder %s56_s20, %s56_s20 }
  0x3e   :  { %p394_p13 = scmp.ne.s32.totalorder %s56_s20, %s393_s1  ;;  %p399_p1 = scmp.lt.s32.totalorder %s393_s1, %s393_s1 }
  0x40   :  { %p400_p2 = por %p399_p1, %p398_p0 }
  0x42   :  { %p401_p3 = pnand %p400_p2, %p394_p13 }
  0x44   :  { %404 = shalt.err (!%p401_p3)
}
  0x45   :  { %61 = dma.hbm_to_vmem [thread:$0]  %s530_s3, 256, %s56_s20, [#allocation10], %s414_s0, %s414_s0, %s415_s10  }
  0x46   :  { %405 = dma.done.wait [#allocation5], 128  }
  0x47   :  { %406 = vsyncadd [#allocation5], 4294967168 }
  0x48   :  { %407 = dma.done.wait [#allocation7], 384  }
  0x49   :  { %408 = vsyncadd [#allocation7], 4294966912 }
  0x4a   :  { %409 = dma.done.wait [#allocation10], 256  }
  0x4b   :  { %410 = vsyncadd [#allocation10], 4294967040  ;;  %v417_v1 = vmov 0.0   ;;  %vm418_vm0 = vmmov 0   ;;  %v309_v2 = vld [vmem:[#allocation9] sm:$0xff]   ;;  %v310_v3 = vld [vmem:[#allocation8] sm:$0xff]  }
  0x4c   :  { %285 = vmatprep.subr.bf16.mxu0 %v417_v1  ;;  %293 = vmatprep.subr.bf16.mxu1 %v417_v1  ;;  %v311_v4 = vld [vmem:[#allocation9 + $0x8] sm:$0xff]   ;;  %v312_v5 = vld [vmem:[#allocation8 + $0x8] sm:$0xff]   ;;  %v88_v7 = vld [vmem:[#allocation4] sm:$0xff]  ;;  %vm113_vm1 = vcmask 261120   ;;  %vm260_vm3 = vcmask 7168  }
  0x4d   :  { %289 = vmatprep.mubr.msk.bf16.mxu0 %vm418_vm0, %v417_v1  ;;  %297 = vmatprep.mubr.msk.bf16.mxu1 %vm418_vm0, %v417_v1  ;;  %v90_v6 = vld [vmem:[#allocation6] sm:$0xff]  ;;  %v89_v9 = vpack.c.bf16 %v88_v7, %v88_v7  ;;  %v275_v12 = vld [vmem:[%s531_s4] ss:$0 sm:$0xff] }
  0x4e   :  { %286 = vmatpush3.bf16.msra.mxu0 %v309_v2  ;;  %294 = vmatpush3.bf16.msra.mxu1 %v310_v3  ;;  %v91_v8 = vpack.c.bf16 %v90_v6, %v90_v6  ;;  %v276_v19 = vld [vmem:[%s532_s5] ss:$0 sm:$0xff] }
  0x4f   :  { %287 = vmatprep.subr.bf16.mxu0 %v417_v1  ;;  %295 = vmatprep.subr.bf16.mxu1 %v417_v1  ;;  %v277_v23 = vld [vmem:[%s533_s6] ss:$0 sm:$0xff] }
  0x50   :  { %v278_v26 = vld [vmem:[#allocation3] ss:$0 sm:$0xff] }
  0x52   :  { %288 = vmatpush3.bf16.msra.mxu0 %v311_v4  ;;  %296 = vmatpush3.bf16.msra.mxu1 %v312_v5 }
  0x55   :  { %290 = vmatmul.mubr.msk.bf16.vlgmr.msra.gmra.mrb[0].mxu0 %vm113_vm1, %v91_v8  ;;  %298 = vmatmul.mubr.msk.bf16.vlgmr.msra.gmra.mrb[0].mxu1 %vm113_vm1, %v89_v9 }
 0x128   :  { %v151_v10 = vpop.f32.mrb[0].mxu0  ;;  %v206_v11 = vpop.f32.mrb[0].mxu1 }
 0x129   :  { %v291_v13 = vpop.f32.mrb[1].mxu0  ;;  %v207_v14 = vadd.f32 %v206_v11, %v151_v10  ;;  %v299_v15 = vpop.f32.mrb[1].mxu1 }
 0x12a   :  { %v154_v16 = vpop.f32.mrb[2].mxu0  ;;  %v209_v17 = vpop.f32.mrb[2].mxu1 }
 0x12b   :  { %v292_v18 = vpop.f32.mrb[3].mxu0  ;;  %v225_v20 = vadd.f32 %v275_v12, %v207_v14  ;;  %v300_v21 = vpop.f32.mrb[3].mxu1 }
 0x12d   :  { %vm226_vm2 = vcmp.gt.f32.partialorder %v225_v20, 0.0  ;;  %v234_v22 = vmul.f32 %v276_v19, %v225_v20 }
 0x12f   :  { %v235_v24 = vsel %vm226_vm2, %v225_v20, %v234_v22 }
 0x130   :  { %v243_v25 = vmul.f32 %v277_v23, %v235_v24 }
 0x132   :  { %244 = vadd.xlane.f32.xlu0 %v243_v25 }
 0x1bf   :  { %v245_v27 = vpop.xlane.xlu0 %244 }
 0x1c0   :  { %v253_v28 = vadd.f32 %v278_v26, %v245_v27 }
 0x1c2   :  { %v254_v29 = vsub.f32 0.0, %v253_v28 }
 0x1c4   :  { %v255_v30 = vmul.f32 1.442695, %v254_v29 }
 0x1c6   :  { %313 = vpow2.f32 %v255_v30 }
 0x1d0   :  { %v314_v31 = vpop.eup %313 }
 0x1d1   :  { %v257_v32 = vadd.f32 1.0, %v314_v31 }
 0x1d3   :  { %315 = vrcp.f32 %v257_v32 }
 0x1dd   :  { %v316_v33 = vpop.eup %315 }
 0x1de   :  { %261 = vst.msk [vmem:[%s535_s8] sm:$0xff] %vm260_vm3, %v316_v33 }
 0x1df   :  { %266 = vsyncpa [#allocation5], 1 }
 0x1e0   :  { %267 = vsyncpa [#allocation7], 1 }
 0x1e1   :  { %268 = vsyncpa [#allocation10], 1 }

</bundles_post_ra>
